<compile_context>
chip_gen: v7x
topology: tpu7x:2x2x1
jax: 0.10.0
libtpu: 0.0.40
codegen_flags: <defaults>
</compile_context>

<pallas_src>
import jax
import jax.numpy as jnp
from jax.experimental import pallas as pl
from jax.experimental.pallas import tpu as pltpu


def _patch_embed_kernel_resident(x_ref, w_ref, b_ref, o_ref):
    # x_ref: (tm, K_pad) bf16 patch rows
    # w_ref: (K_pad, E_pad) bf16 projection weight, already [K, E] oriented
    # b_ref: (1, E_pad) f32 bias
    # o_ref: (tm, E_pad) out_dtype output
    acc = jnp.dot(x_ref[...], w_ref[...], preferred_element_type=jnp.float32)
    o_ref[...] = (acc + b_ref[...]).astype(o_ref.dtype)


def _patch_embed_kernel_ktiled(x_ref, w_ref, b_ref, o_ref, acc_ref):
    # Reduction over a K grid axis with an f32 VMEM accumulator (pattern P3).
    k = pl.program_id(1)

    @pl.when(k == 0)
    def _():
        acc_ref[...] = jnp.zeros_like(acc_ref)

    acc_ref[...] += jnp.dot(x_ref[...], w_ref[...],
                            preferred_element_type=jnp.float32)

    @pl.when(k == pl.num_programs(1) - 1)
    def _():
        o_ref[...] = (acc_ref[...] + b_ref[...]).astype(o_ref.dtype)


def _round_up(x, m):
    return ((x + m - 1) // m) * m


def patch_embedding_3d(x, weight, bias, patch_size, *,
                       compute_dtype=jnp.bfloat16,
                       out_dtype=jnp.bfloat16):
    """x: [B, C, D, H, W]; weight: [E, C, p, p, p] (PyTorch Conv3d layout);
    bias: [E]. Returns [B, N, E] with N = (D//p)*(H//p)*(W//p)."""
    B, C, D, H, W = x.shape
    E = weight.shape[0]
    p = patch_size
    nd, nh, nw = D // p, H // p, W // p
    N = nd * nh * nw
    K = C * p * p * p
    M = B * N

    in_bytes = jnp.dtype(compute_dtype).itemsize
    out_bytes = jnp.dtype(out_dtype).itemsize
    row_align = 16 if in_bytes == 2 else 8

    # Lane-dense embedding dim: pad E to a multiple of 128; for mid-size E try
    # a 256 multiple so the 2x256x256 MXU (v6e/v7x) tile is better filled.
    E_pad = max(128, _round_up(E, 128))
    if E > 128:
        e256 = _round_up(E, 256)
        if e256 - E <= max(64, E // 4):
            E_pad = e256

    K_base = _round_up(K, 128)   # lane-/sublane-aligned contraction dim

    # Generation-aware VMEM budget (v5e/v6e: 128 MiB, v7x: 64 MiB).
    try:
        vmem_cap = int(pltpu.get_tpu_info().vmem_capacity_bytes)
    except Exception:
        vmem_cap = 64 << 20          # conservative (v7x-safe) default
    budget = (2 * vmem_cap) // 3     # leave headroom for compiler scratch

    # --- choose tiles: prefer the resident-weight path (single-buffered weight)
    tm_candidates = (512, 256, 128, 64, 32, 16)
    tm = None
    tk = None
    for cand in tm_candidates:
        need = (2 * cand * K_base * in_bytes        # double-buffered x tiles
                + 2 * cand * E_pad * out_bytes      # double-buffered out tiles
                + K_base * E_pad * in_bytes         # single-buffered weight
                + E_pad * 4)                        # single-buffered bias
        if need <= budget:
            tm = cand
            break

    use_k_grid = tm is None
    if use_k_grid:
        for cand_m in tm_candidates:
            for cand_k in (4096, 2048, 1024, 512, 256, 128):
                if cand_k > K_base:
                    continue
                need = (2 * cand_m * cand_k * in_bytes
                        + 2 * cand_m * E_pad * out_bytes
                        + 2 * cand_k * E_pad * in_bytes
                        + 2 * E_pad * 4
                        + cand_m * E_pad * 4)       # f32 accumulator scratch
                if need <= budget:
                    tm, tk = cand_m, cand_k
                    break
            if tm is not None:
                break
        if tm is None:
            tm, tk = 16, 128   # last resort for absurdly large E_pad
        K_pad = _round_up(K, tk)
    else:
        K_pad = K_base

    # Guarantee >= 2 grid steps over M when there is enough work, so the
    # 'parallel' M axis can be split across both v7x TensorCores.
    M_ru = _round_up(max(M, row_align), row_align)
    if M_ru >= 256:
        tm = min(tm, _round_up(M_ru // 2, row_align))
    tm = max(row_align, min(tm, M_ru))
    M_pad = _round_up(M, tm)

    # --- glue: extract non-overlapping patches, flatten in (c, kd, kh, kw)
    # order to match Conv3d's reduction order.  (See TODO(synk) above.)
    xp = x.reshape(B, C, nd, p, nh, p, nw, p)
    xp = xp.transpose(0, 2, 4, 6, 1, 3, 5, 7)           # [B, nd, nh, nw, C, p, p, p]
    patches = xp.reshape(M, K).astype(compute_dtype)     # [M, K]
    pad_m, pad_k = M_pad - M, K_pad - K
    if pad_m or pad_k:
        patches = jnp.pad(patches, ((0, pad_m), (0, pad_k)))

    # Weight in [K, E_pad] orientation (one-time wrapper transpose, no per-tile
    # in-kernel transpose of the resident block).
    w_kn = weight.reshape(E, K).astype(compute_dtype).T   # [K, E]
    if pad_k or (E_pad != E):
        w_kn = jnp.pad(w_kn, ((0, pad_k), (0, E_pad - E)))
    b_mat = bias.astype(jnp.float32).reshape(1, E)
    if E_pad != E:
        b_mat = jnp.pad(b_mat, ((0, 0), (0, E_pad - E)))

    cost = pl.CostEstimate(
        flops=2 * M_pad * K_pad * E_pad,
        transcendentals=0,
        bytes_accessed=(M_pad * K_pad * in_bytes + K_pad * E_pad * in_bytes
                        + E_pad * 4 + M_pad * E_pad * out_bytes),
    )

    if not use_k_grid:
        grid = (M_pad // tm,)

        def run(single_buffer_consts):
            const_bufs = 1 if single_buffer_consts else 2
            vmem_need = (2 * tm * K_pad * in_bytes
                         + 2 * tm * E_pad * out_bytes
                         + const_bufs * K_pad * E_pad * in_bytes
                         + const_bufs * E_pad * 4)
            vmem_limit = int(min(max(vmem_need + (4 << 20), 16 << 20),
                                 (vmem_cap * 9) // 10))
            extra = ({"pipeline_mode": pl.Buffered(1)}
                     if single_buffer_consts else {})
            return pl.pallas_call(
                _patch_embed_kernel_resident,
                out_shape=jax.ShapeDtypeStruct((M_pad, E_pad), out_dtype),
                grid_spec=pltpu.PrefetchScalarGridSpec(
                    num_scalar_prefetch=0,
                    grid=grid,
                    in_specs=[
                        pl.BlockSpec((tm, K_pad), lambda i: (i, 0)),
                        pl.BlockSpec((K_pad, E_pad), lambda i: (0, 0), **extra),
                        pl.BlockSpec((1, E_pad), lambda i: (0, 0), **extra),
                    ],
                    out_specs=pl.BlockSpec((tm, E_pad), lambda i: (i, 0)),
                ),
                compiler_params=pltpu.CompilerParams(
                    dimension_semantics=("parallel",),
                    vmem_limit_bytes=vmem_limit,
                ),
                cost_estimate=cost,
            )(patches, w_kn, b_mat)

        try:
            out = run(True)
        except Exception:
            # TODO(synk): pl.Buffered(1) single-buffering of the resident
            # weight/bias unsupported on this jax version; fall back to the
            # default double-buffered constant blocks.
            out = run(False)
    else:
        grid = (M_pad // tm, K_pad // tk)
        vmem_need = (2 * tm * tk * in_bytes + 2 * tm * E_pad * out_bytes
                     + 2 * tk * E_pad * in_bytes + 2 * E_pad * 4
                     + tm * E_pad * 4)
        vmem_limit = int(min(max(vmem_need + (4 << 20), 16 << 20),
                             (vmem_cap * 9) // 10))
        out = pl.pallas_call(
            _patch_embed_kernel_ktiled,
            out_shape=jax.ShapeDtypeStruct((M_pad, E_pad), out_dtype),
            grid_spec=pltpu.PrefetchScalarGridSpec(
                num_scalar_prefetch=0,
                grid=grid,
                in_specs=[
                    pl.BlockSpec((tm, tk), lambda i, k: (i, k)),
                    pl.BlockSpec((tk, E_pad), lambda i, k: (k, 0)),
                    pl.BlockSpec((1, E_pad), lambda i, k: (0, 0)),
                ],
                out_specs=pl.BlockSpec((tm, E_pad), lambda i, k: (i, 0)),
                scratch_shapes=[pltpu.VMEM((tm, E_pad), jnp.float32)],
            ),
            compiler_params=pltpu.CompilerParams(
                dimension_semantics=("parallel", "arbitrary"),
                vmem_limit_bytes=vmem_limit,
            ),
            cost_estimate=cost,
        )(patches, w_kn, b_mat)

    out = out[:M, :E]
    return out.reshape(B, N, E)


if __name__ == "__main__":
    # Small shapes consistent with the module.
    B, C, D, H, W = 2, 4, 8, 8, 8
    patch_size = 4
    embed_dim = 32

    key = jax.random.PRNGKey(0)
    kx, kw, kb = jax.random.split(key, 3)

    x = jax.random.normal(kx, (B, C, D, H, W), dtype=jnp.float32)
    # Deterministic parameter init (Conv3d weight/bias shapes).
    fan_in = C * patch_size ** 3
    weight = jax.random.normal(
        kw, (embed_dim, C, patch_size, patch_size, patch_size),
        dtype=jnp.float32) * (1.0 / jnp.sqrt(fan_in))
    bias = jax.random.normal(kb, (embed_dim,), dtype=jnp.float32) * 0.01

    out = patch_embedding_3d(x, weight, bias, patch_size)
    out = jax.block_until_ready(out)

    # Reference: real strided 3D convolution (f32), flattened + transposed like
    # the PyTorch module's forward.
    ref = jax.lax.conv_general_dilated(
        x, weight,
        window_strides=(patch_size,) * 3,
        padding="VALID",
        dimension_numbers=("NCDHW", "OIDHW", "NCDHW"),
    ) + bias.reshape(1, embed_dim, 1, 1, 1)
    ref = ref.reshape(B, embed_dim, -1).transpose(0, 2, 1)

    n_patches = (D // patch_size) * (H // patch_size) * (W // patch_size)
    assert out.shape == (B, n_patches, embed_dim)
    # bf16 operands + bf16 output store with f32 accumulation: loose tolerance.
    out_f32 = out.astype(jnp.float32)
    assert jnp.allclose(out_f32, ref, atol=5e-2, rtol=5e-2), (
        f"max abs err {jnp.max(jnp.abs(out_f32 - ref))}")
    print("KERNEL_OK")
</pallas_src>

<mosaic_0001>
module attributes {stable_mosaic.version = 11 : i64} {
  func.func @_patch_embed_kernel_resident(%arg0: i32, %arg1: memref<16x256xbf16, #tpu.memory_space<vmem>>, %arg2: memref<256x128xbf16, #tpu.memory_space<vmem>>, %arg3: memref<1x128xf32, #tpu.memory_space<vmem>>, %arg4: memref<16x128xbf16, #tpu.memory_space<vmem>>) attributes {dimension_semantics = [#tpu.dimension_semantics<parallel>], iteration_bounds = array<i64: 1>, scalar_prefetch = 0 : i64, scratch_operands = 0 : i64, tpu.core_type = #tpu.core_type<tc>, window_params = [{transform_indices = @transform_0, window_bounds = array<i64: 16, 256>}, {pipeline_mode = #tpu.pipeline_mode<synchronous>, transform_indices = @transform_1, window_bounds = array<i64: 256, 128>}, {pipeline_mode = #tpu.pipeline_mode<synchronous>, transform_indices = @transform_2, window_bounds = array<i64: 1, 128>}, {transform_indices = @transform_3, window_bounds = array<i64: 16, 128>}]} {
    %c0 = arith.constant 0 : index
    %c0_0 = arith.constant 0 : index
    %0 = vector.load %arg1[%c0, %c0_0] : memref<16x256xbf16, #tpu.memory_space<vmem>>, vector<16x256xbf16>
    %c0_1 = arith.constant 0 : index
    %c0_2 = arith.constant 0 : index
    %1 = vector.load %arg2[%c0_1, %c0_2] : memref<256x128xbf16, #tpu.memory_space<vmem>>, vector<256x128xbf16>
    %cst = arith.constant dense<0.000000e+00> : vector<16x128xf32>
    %2 = tpu.matmul %0, %1, %cst {dimension_numbers = #tpu.dot_dimension_numbers<[1], [0], [0], [1], [0, 0, 1, 1], [], []>} : vector<16x256xbf16>, vector<256x128xbf16>, vector<16x128xf32> -> vector<16x128xf32>
    %c0_3 = arith.constant 0 : index
    %c0_4 = arith.constant 0 : index
    %3 = vector.load %arg3[%c0_3, %c0_4] : memref<1x128xf32, #tpu.memory_space<vmem>>, vector<1x128xf32>
    %4 = vector.broadcast %3 : vector<1x128xf32> to vector<16x128xf32>
    %5 = arith.addf %2, %4 : vector<16x128xf32>
    %6 = arith.truncf %5 : vector<16x128xf32> to vector<16x128xbf16>
    %c0_5 = arith.constant 0 : index
    %c0_6 = arith.constant 0 : index
    %7 = vector.load %arg4[%c0_5, %c0_6] : memref<16x128xbf16, #tpu.memory_space<vmem>>, vector<16x128xbf16>
    tpu.vector_store %arg4[%c0_5, %c0_6], %6 {strides = array<i32>} : memref<16x128xbf16, #tpu.memory_space<vmem>>, vector<16x128xbf16>,
    return
  }
  func.func @transform_0(%arg0: i32) -> (i32, i32) {
    %c0_i32 = arith.constant 0 : i32
    %c0_i32_0 = arith.constant 0 : i32
    return %arg0, %c0_i32 : i32, i32
  }
  func.func @transform_1(%arg0: i32) -> (i32, i32) {
    %c0_i32 = arith.constant 0 : i32
    %c0_i32_0 = arith.constant 0 : i32
    %c0_i32_1 = arith.constant 0 : i32
    return %c0_i32, %c0_i32_0 : i32, i32
  }
  func.func @transform_2(%arg0: i32) -> (i32, i32) {
    %c0_i32 = arith.constant 0 : i32
    %c0_i32_0 = arith.constant 0 : i32
    %c0_i32_1 = arith.constant 0 : i32
    return %c0_i32, %c0_i32_0 : i32, i32
  }
  func.func @transform_3(%arg0: i32) -> (i32, i32) {
    %c0_i32 = arith.constant 0 : i32
    %c0_i32_0 = arith.constant 0 : i32
    return %arg0, %c0_i32 : i32, i32
  }
}

module attributes {stable_mosaic.version = 11 : i64} {
  func.func @_patch_embed_kernel_resident(%arg0: i32, %arg1: memref<16x256xbf16, #tpu.memory_space<vmem>>, %arg2: memref<256x128xbf16, #tpu.memory_space<vmem>>, %arg3: memref<1x128xf32, #tpu.memory_space<vmem>>, %arg4: memref<16x128xbf16, #tpu.memory_space<vmem>>) attributes {dimension_semantics = [#tpu.dimension_semantics<parallel>], iteration_bounds = array<i64: 1>, scalar_prefetch = 0 : i64, scratch_operands = 0 : i64, tpu.core_type = #tpu.core_type<tc>, window_params = [{transform_indices = @transform_0, window_bounds = array<i64: 16, 256>}, {pipeline_mode = #tpu.pipeline_mode<synchronous>, transform_indices = @transform_1, window_bounds = array<i64: 256, 128>}, {pipeline_mode = #tpu.pipeline_mode<synchronous>, transform_indices = @transform_2, window_bounds = array<i64: 1, 128>}, {transform_indices = @transform_3, window_bounds = array<i64: 16, 128>}]} {
    %c0 = arith.constant 0 : index
    %c0_0 = arith.constant 0 : index
    %0 = vector.load %arg1[%c0, %c0_0] : memref<16x256xbf16, #tpu.memory_space<vmem>>, vector<16x256xbf16>
    %c0_1 = arith.constant 0 : index
    %c0_2 = arith.constant 0 : index
    %1 = vector.load %arg2[%c0_1, %c0_2] : memref<256x128xbf16, #tpu.memory_space<vmem>>, vector<256x128xbf16>
    %cst = arith.constant dense<0.000000e+00> : vector<16x128xf32>
    %2 = tpu.matmul %0, %1, %cst {dimension_numbers = #tpu.dot_dimension_numbers<[1], [0], [0], [1], [0, 0, 1, 1], [], []>} : vector<16x256xbf16>, vector<256x128xbf16>, vector<16x128xf32> -> vector<16x128xf32>
    %c0_3 = arith.constant 0 : index
    %c0_4 = arith.constant 0 : index
    %3 = vector.load %arg3[%c0_3, %c0_4] : memref<1x128xf32, #tpu.memory_space<vmem>>, vector<1x128xf32>
    %4 = vector.broadcast %3 : vector<1x128xf32> to vector<16x128xf32>
    %5 = arith.addf %2, %4 : vector<16x128xf32>
    %6 = arith.truncf %5 : vector<16x128xf32> to vector<16x128xbf16>
    %c0_5 = arith.constant 0 : index
    %c0_6 = arith.constant 0 : index
    %7 = vector.load %arg4[%c0_5, %c0_6] : memref<16x128xbf16, #tpu.memory_space<vmem>>, vector<16x128xbf16>
    tpu.vector_store %arg4[%c0_5, %c0_6], %6 {strides = array<i32>} : memref<16x128xbf16, #tpu.memory_space<vmem>>, vector<16x128xbf16>,
    return
  }
  func.func @transform_0(%arg0: i32) -> (i32, i32) {
    %c0_i32 = arith.constant 0 : i32
    %c0_i32_0 = arith.constant 0 : i32
    return %arg0, %c0_i32 : i32, i32
  }
  func.func @transform_1(%arg0: i32) -> (i32, i32) {
    %c0_i32 = arith.constant 0 : i32
    %c0_i32_0 = arith.constant 0 : i32
    %c0_i32_1 = arith.constant 0 : i32
    return %c0_i32, %c0_i32_0 : i32, i32
  }
  func.func @transform_2(%arg0: i32) -> (i32, i32) {
    %c0_i32 = arith.constant 0 : i32
    %c0_i32_0 = arith.constant 0 : i32
    %c0_i32_1 = arith.constant 0 : i32
    return %c0_i32, %c0_i32_0 : i32, i32
  }
  func.func @transform_3(%arg0: i32) -> (i32, i32) {
    %c0_i32 = arith.constant 0 : i32
    %c0_i32_0 = arith.constant 0 : i32
    return %arg0, %c0_i32 : i32, i32
  }
}

</mosaic_0001>

<bundles_post_ra>
// kernel: tpu_custom_call.1
= control target key start
LH: loop header
LB: loop body
LE: loop exit
PB: predicated region body
PF: predicated region fallthrough
CT: control target
= control target key end

     0   :  { %8 = vsyncpa [#allocation3], 0  ;;  %s480_s0 = inlined_call_operand.hbm [shape: bf16[16,256], index: 0, kind: input, shape index: {}]   ;;  %s481_s1 = inlined_call_operand.hbm [shape: bf16[256,128], index: 1, kind: input, shape index: {}]   ;;  %s482_s2 = inlined_call_operand.vmem [shape: f32[1,128], index: 2, kind: input, shape index: {}]   ;;  %s483_s3 = inlined_call_operand.hbm [shape: bf16[16,128], index: 3, kind: output, shape index: {}]  }
   0x1   :  { %9 = vsyncpa [#allocation6], 0 }
   0x2   :  { %10 = vsyncpa [#allocation4], 0  ;;  %s408_s12 = smov [#allocation2]   ;;  %s336_s16 = scalar_lea.hbm %s480_s0, 256 }
   0x3   :  { %s16_s13 = sshll.u32 %s408_s12, 4  ;;  %p337_p0 = scmp.ne.s32.totalorder %s480_s0, %s336_s16  ;;  %s17_s13 = int_to_ptr.vmem [resolvable:$true] %s16_s13 }
   0x4   :  { %p340_p1 = scmp.lt.u32.totalorder %s336_s16, %s480_s0 }
   0x6   :  { %p342_p2 = pnand %p340_p1, %p337_p0 }
   0x8   :  { %345 = shalt.err (!%p342_p2)
}
   0x9   :  { %s346_s21 = scalar_lea.vmem %s17_s13, 256  ;;  %p351_p4 = scmp.lt.s32.totalorder %s17_s13, %s17_s13 }
   0xa   :  { %p347_p3 = scmp.ne.s32.totalorder %s17_s13, %s346_s21  ;;  %p352_p5 = scmp.lt.s32.totalorder %s346_s21, %s346_s21 }
   0xc   :  { %p353_p6 = por %p352_p5, %p351_p4 }
   0xe   :  { %p354_p7 = pnand %p353_p6, %p347_p3 }
  0x10   :  { %357 = shalt.err (!%p354_p7)
}
  0x11   :  { %s409_s22 = smov 128   ;;  %s410_s23 = smov 8  }
  0x12   :  { %22 = dma.hbm_to_vmem [thread:$0]  %s480_s0, 256, %s17_s13, [#allocation3], %s409_s22, %s409_s22, %s410_s23  }
  0x13   :  { %s411_s26 = smov [#allocation5]   ;;  %s358_s30 = scalar_lea.hbm %s481_s1, 2048 }
  0x14   :  { %s28_s27 = sshll.u32 %s411_s26, 4  ;;  %p359_p8 = scmp.ne.s32.totalorder %s481_s1, %s358_s30  ;;  %s29_s27 = int_to_ptr.vmem [resolvable:$true] %s28_s27 }
  0x15   :  { %p362_p9 = scmp.lt.u32.totalorder %s358_s30, %s481_s1 }
  0x17   :  { %p364_p10 = pnand %p362_p9, %p359_p8 }
  0x19   :  { %367 = shalt.err (!%p364_p10)
}
  0x1a   :  { %s368_s8 = scalar_lea.vmem %s29_s27, 2048  ;;  %p373_p12 = scmp.lt.s32.totalorder %s29_s27, %s29_s27 }
  0x1b   :  { %p369_p11 = scmp.ne.s32.totalorder %s29_s27, %s368_s8  ;;  %p374_p13 = scmp.lt.s32.totalorder %s368_s8, %s368_s8 }
  0x1d   :  { %p375_p0 = por %p374_p13, %p373_p12 }
  0x1f   :  { %p376_p1 = pnand %p375_p0, %p369_p11 }
  0x21   :  { %379 = shalt.err (!%p376_p1)
}
  0x22   :  { %s412_s0 = smov 64   ;;  %s413_s9 = smov 4  }
  0x23   :  { %34 = dma.hbm_to_vmem [thread:$0]  %s481_s1, 2048, %s29_s27, [#allocation6], %s412_s0, %s412_s0, %s413_s9  }
  0x24   :  { %402 = dma.done.wait [#allocation3], 256  }
  0x25   :  { %403 = vsyncadd [#allocation3], 4294967040 }
  0x26   :  { %404 = dma.done.wait [#allocation6], 2048  }
  0x27   :  { %405 = vsyncadd [#allocation6], 4294965248  ;;  %v317_v0 = vld [vmem:[#allocation5 + $0x40] sm:$0xff]   ;;  %v319_v2 = vld [vmem:[#allocation5 + $0x48] sm:$0xff]   ;;  %s414_s13 = smov [#allocation7]  }
  0x28   :  { %v318_v1 = vld [vmem:[#allocation5] sm:$0xff]   ;;  %288 = vmatprep.subr.bf16.mxu0 %v317_v0  ;;  %v320_v3 = vld [vmem:[#allocation5 + $0x8] sm:$0xff]   ;;  %v321_v4 = vld [vmem:[#allocation5 + $0x50] sm:$0xff]   ;;  %s247_s14 = sshll.u32 %s414_s13, 4  ;;  %s248_s14 = int_to_ptr.vmem [resolvable:$true] %s247_s14 }
  0x29   :  { %289 = vmatpush3.bf16.msra.mxu0 %v318_v1  ;;  %v322_v5 = vld [vmem:[#allocation5 + $0x10] sm:$0xff]   ;;  %v323_v6 = vld [vmem:[#allocation5 + $0x58] sm:$0xff]   ;;  %v325_v8 = vld [vmem:[#allocation5 + $0x60] sm:$0xff]   ;;  %s380_s15 = scalar_lea.vmem %s248_s14, 128  ;;  %p385_p3 = scmp.lt.s32.totalorder %s248_s14, %s248_s14 }
  0x2a   :  { %290 = vmatprep.subr.bf16.mxu0 %v319_v2  ;;  %v324_v7 = vld [vmem:[#allocation5 + $0x18] sm:$0xff]   ;;  %v326_v9 = vld [vmem:[#allocation5 + $0x20] sm:$0xff]   ;;  %v327_v10 = vld [vmem:[#allocation5 + $0x68] sm:$0xff]   ;;  %p381_p2 = scmp.ne.s32.totalorder %s248_s14, %s380_s15  ;;  %p386_p4 = scmp.lt.s32.totalorder %s380_s15, %s380_s15 }
  0x2b   :  { %v335_v11 = vld [vmem:[#allocation2 + $0x4] ss:$8 sps:$4 sm:$0xff]   ;;  %v328_v12 = vld [vmem:[#allocation5 + $0x28] sm:$0xff]   ;;  %v333_v17 = vld [vmem:[#allocation2] ss:$8 sps:$4 sm:$0xff]  }
  0x2c   :  { %223 = vmatprep.mubr.bf16.mxu0 %v335_v11  ;;  %v329_v13 = vld [vmem:[#allocation5 + $0x70] sm:$0xff]   ;;  %v331_v15 = vld [vmem:[#allocation5 + $0x78] sm:$0xff]   ;;  %p387_p5 = por %p386_p4, %p385_p3 }
  0x2d   :  { %291 = vmatpush3.bf16.msra.mxu0 %v320_v3  ;;  %v330_v14 = vld [vmem:[#allocation5 + $0x30] sm:$0xff]   ;;  %v332_v16 = vld [vmem:[#allocation5 + $0x38] sm:$0xff]  }
  0x2e   :  { %292 = vmatprep.subr.bf16.mxu0 %v321_v4  ;;  %v260_v22 = vld [vmem:[%s482_s2] ss:$0 sm:$0xff]  ;;  %p388_p6 = pnand %p387_p5, %p381_p2 }
  0x31   :  { %293 = vmatpush3.bf16.msra.mxu0 %v322_v5 }
  0x32   :  { %294 = vmatprep.subr.bf16.mxu0 %v323_v6 }
  0x35   :  { %295 = vmatpush3.bf16.msra.mxu0 %v324_v7 }
  0x36   :  { %296 = vmatprep.subr.bf16.mxu0 %v325_v8 }
  0x39   :  { %297 = vmatpush3.bf16.msra.mxu0 %v326_v9 }
  0x3a   :  { %298 = vmatprep.subr.bf16.mxu0 %v327_v10 }
  0x3d   :  { %299 = vmatpush3.bf16.msra.mxu0 %v328_v12 }
  0x3e   :  { %300 = vmatprep.subr.bf16.mxu0 %v329_v13 }
  0x41   :  { %301 = vmatpush3.bf16.msra.mxu0 %v330_v14 }
  0x42   :  { %302 = vmatprep.subr.bf16.mxu0 %v331_v15 }
  0x45   :  { %303 = vmatpush3.bf16.msra.mxu0 %v332_v16 }
  0x48   :  { %224 = vmatmul.mubr.bf16.vlgmr.msra.gmra.mrb[0].mxu0 %v333_v17 }
 0x11b   :  { %v304_v18 = vpop.f32.mrb[0].mxu0 }
 0x11c   :  { %v305_v19 = vpop.f32.mrb[1].mxu0 }
 0x11d   :  { %v306_v20 = vadd.f32 %v305_v19, %v304_v18  ;;  %v307_v21 = vpop.f32.mrb[2].mxu0 }
 0x11e   :  { %v308_v23 = vpop.f32.mrb[3].mxu0 }
 0x11f   :  { %v309_v24 = vadd.f32 %v308_v23, %v307_v21  ;;  %v226_v25 = vadd.f32 %v306_v20, %v260_v22 }
 0x121   :  { %v229_v26 = vadd.f32 %v309_v24, %v260_v22 }
 0x123   :  { %v286_v27 = vpack.c.bf16 %v229_v26, %v226_v25 }
 0x125   :  { %287 = vst [vmem:[#allocation7] sm:$0xff] %v286_v27  }
 0x126   :  { %391 = shalt.err (!%p388_p6)
}
 0x127   :  { %s392_s2 = scalar_lea.hbm %s483_s3, 128 }
 0x128   :  { %p393_p7 = scmp.ne.s32.totalorder %s483_s3, %s392_s2  ;;  %p396_p8 = scmp.lt.u32.totalorder %s392_s2, %s483_s3 }
 0x12a   :  { %p398_p9 = pnand %p396_p8, %p393_p7 }
 0x12c   :  { %401 = shalt.err (!%p398_p9)
}
 0x12d   :  { %253 = dma.vmem_to_hbm [thread:$0]  %s248_s14, 128, %s483_s3, [#allocation4], %s412_s0, %s412_s0, %s413_s9  }
 0x12e   :  { %406 = dma.done.wait [#allocation4], 128  }
 0x12f   :  { %407 = vsyncadd [#allocation4], 4294967168 }
 0x130   :  { %257 = vsyncpa [#allocation3], 1 }
 0x131   :  { %258 = vsyncpa [#allocation6], 1 }
 0x132   :  { %259 = vsyncpa [#allocation4], 1 }

// kernel: tpu_custom_call.1
= control target key start
LH: loop header
LB: loop body
LE: loop exit
PB: predicated region body
PF: predicated region fallthrough
CT: control target
= control target key end

     0   :  { %8 = vsyncpa [#allocation3], 0  ;;  %s480_s0 = inlined_call_operand.hbm [shape: bf16[16,256], index: 0, kind: input, shape index: {}]   ;;  %s481_s1 = inlined_call_operand.hbm [shape: bf16[256,128], index: 1, kind: input, shape index: {}]   ;;  %s482_s2 = inlined_call_operand.vmem [shape: f32[1,128], index: 2, kind: input, shape index: {}]   ;;  %s483_s3 = inlined_call_operand.hbm [shape: bf16[16,128], index: 3, kind: output, shape index: {}]  }
   0x1   :  { %9 = vsyncpa [#allocation6], 0 }
   0x2   :  { %10 = vsyncpa [#allocation4], 0  ;;  %s408_s12 = smov [#allocation2]   ;;  %s336_s16 = scalar_lea.hbm %s480_s0, 256 }
   0x3   :  { %s16_s13 = sshll.u32 %s408_s12, 4  ;;  %p337_p0 = scmp.ne.s32.totalorder %s480_s0, %s336_s16  ;;  %s17_s13 = int_to_ptr.vmem [resolvable:$true] %s16_s13 }
   0x4   :  { %p340_p1 = scmp.lt.u32.totalorder %s336_s16, %s480_s0 }
   0x6   :  { %p342_p2 = pnand %p340_p1, %p337_p0 }
   0x8   :  { %345 = shalt.err (!%p342_p2)
}
   0x9   :  { %s346_s21 = scalar_lea.vmem %s17_s13, 256  ;;  %p351_p4 = scmp.lt.s32.totalorder %s17_s13, %s17_s13 }
   0xa   :  { %p347_p3 = scmp.ne.s32.totalorder %s17_s13, %s346_s21  ;;  %p352_p5 = scmp.lt.s32.totalorder %s346_s21, %s346_s21 }
   0xc   :  { %p353_p6 = por %p352_p5, %p351_p4 }
   0xe   :  { %p354_p7 = pnand %p353_p6, %p347_p3 }
  0x10   :  { %357 = shalt.err (!%p354_p7)
}
  0x11   :  { %s409_s22 = smov 128   ;;  %s410_s23 = smov 8  }
  0x12   :  { %22 = dma.hbm_to_vmem [thread:$0]  %s480_s0, 256, %s17_s13, [#allocation3], %s409_s22, %s409_s22, %s410_s23  }
  0x13   :  { %s411_s26 = smov [#allocation5]   ;;  %s358_s30 = scalar_lea.hbm %s481_s1, 2048 }
  0x14   :  { %s28_s27 = sshll.u32 %s411_s26, 4  ;;  %p359_p8 = scmp.ne.s32.totalorder %s481_s1, %s358_s30  ;;  %s29_s27 = int_to_ptr.vmem [resolvable:$true] %s28_s27 }
  0x15   :  { %p362_p9 = scmp.lt.u32.totalorder %s358_s30, %s481_s1 }
  0x17   :  { %p364_p10 = pnand %p362_p9, %p359_p8 }
  0x19   :  { %367 = shalt.err (!%p364_p10)
}
  0x1a   :  { %s368_s8 = scalar_lea.vmem %s29_s27, 2048  ;;  %p373_p12 = scmp.lt.s32.totalorder %s29_s27, %s29_s27 }
  0x1b   :  { %p369_p11 = scmp.ne.s32.totalorder %s29_s27, %s368_s8  ;;  %p374_p13 = scmp.lt.s32.totalorder %s368_s8, %s368_s8 }
  0x1d   :  { %p375_p0 = por %p374_p13, %p373_p12 }
  0x1f   :  { %p376_p1 = pnand %p375_p0, %p369_p11 }
  0x21   :  { %379 = shalt.err (!%p376_p1)
}
  0x22   :  { %s412_s0 = smov 64   ;;  %s413_s9 = smov 4  }
  0x23   :  { %34 = dma.hbm_to_vmem [thread:$0]  %s481_s1, 2048, %s29_s27, [#allocation6], %s412_s0, %s412_s0, %s413_s9  }
  0x24   :  { %402 = dma.done.wait [#allocation3], 256  }
  0x25   :  { %403 = vsyncadd [#allocation3], 4294967040 }
  0x26   :  { %404 = dma.done.wait [#allocation6], 2048  }
  0x27   :  { %405 = vsyncadd [#allocation6], 4294965248  ;;  %v317_v0 = vld [vmem:[#allocation5 + $0x40] sm:$0xff]   ;;  %v319_v2 = vld [vmem:[#allocation5 + $0x48] sm:$0xff]   ;;  %s414_s13 = smov [#allocation7]  }
  0x28   :  { %v318_v1 = vld [vmem:[#allocation5] sm:$0xff]   ;;  %288 = vmatprep.subr.bf16.mxu0 %v317_v0  ;;  %v320_v3 = vld [vmem:[#allocation5 + $0x8] sm:$0xff]   ;;  %v321_v4 = vld [vmem:[#allocation5 + $0x50] sm:$0xff]   ;;  %s247_s14 = sshll.u32 %s414_s13, 4  ;;  %s248_s14 = int_to_ptr.vmem [resolvable:$true] %s247_s14 }
  0x29   :  { %289 = vmatpush3.bf16.msra.mxu0 %v318_v1  ;;  %v322_v5 = vld [vmem:[#allocation5 + $0x10] sm:$0xff]   ;;  %v323_v6 = vld [vmem:[#allocation5 + $0x58] sm:$0xff]   ;;  %v325_v8 = vld [vmem:[#allocation5 + $0x60] sm:$0xff]   ;;  %s380_s15 = scalar_lea.vmem %s248_s14, 128  ;;  %p385_p3 = scmp.lt.s32.totalorder %s248_s14, %s248_s14 }
  0x2a   :  { %290 = vmatprep.subr.bf16.mxu0 %v319_v2  ;;  %v324_v7 = vld [vmem:[#allocation5 + $0x18] sm:$0xff]   ;;  %v326_v9 = vld [vmem:[#allocation5 + $0x20] sm:$0xff]   ;;  %v327_v10 = vld [vmem:[#allocation5 + $0x68] sm:$0xff]   ;;  %p381_p2 = scmp.ne.s32.totalorder %s248_s14, %s380_s15  ;;  %p386_p4 = scmp.lt.s32.totalorder %s380_s15, %s380_s15 }
  0x2b   :  { %v335_v11 = vld [vmem:[#allocation2 + $0x4] ss:$8 sps:$4 sm:$0xff]   ;;  %v328_v12 = vld [vmem:[#allocation5 + $0x28] sm:$0xff]   ;;  %v333_v17 = vld [vmem:[#allocation2] ss:$8 sps:$4 sm:$0xff]  }
  0x2c   :  { %223 = vmatprep.mubr.bf16.mxu0 %v335_v11  ;;  %v329_v13 = vld [vmem:[#allocation5 + $0x70] sm:$0xff]   ;;  %v331_v15 = vld [vmem:[#allocation5 + $0x78] sm:$0xff]   ;;  %p387_p5 = por %p386_p4, %p385_p3 }
  0x2d   :  { %291 = vmatpush3.bf16.msra.mxu0 %v320_v3  ;;  %v330_v14 = vld [vmem:[#allocation5 + $0x30] sm:$0xff]   ;;  %v332_v16 = vld [vmem:[#allocation5 + $0x38] sm:$0xff]  }
  0x2e   :  { %292 = vmatprep.subr.bf16.mxu0 %v321_v4  ;;  %v260_v22 = vld [vmem:[%s482_s2] ss:$0 sm:$0xff]  ;;  %p388_p6 = pnand %p387_p5, %p381_p2 }
  0x31   :  { %293 = vmatpush3.bf16.msra.mxu0 %v322_v5 }
  0x32   :  { %294 = vmatprep.subr.bf16.mxu0 %v323_v6 }
  0x35   :  { %295 = vmatpush3.bf16.msra.mxu0 %v324_v7 }
  0x36   :  { %296 = vmatprep.subr.bf16.mxu0 %v325_v8 }
  0x39   :  { %297 = vmatpush3.bf16.msra.mxu0 %v326_v9 }
  0x3a   :  { %298 = vmatprep.subr.bf16.mxu0 %v327_v10 }
  0x3d   :  { %299 = vmatpush3.bf16.msra.mxu0 %v328_v12 }
  0x3e   :  { %300 = vmatprep.subr.bf16.mxu0 %v329_v13 }
  0x41   :  { %301 = vmatpush3.bf16.msra.mxu0 %v330_v14 }
  0x42   :  { %302 = vmatprep.subr.bf16.mxu0 %v331_v15 }
  0x45   :  { %303 = vmatpush3.bf16.msra.mxu0 %v332_v16 }
  0x48   :  { %224 = vmatmul.mubr.bf16.vlgmr.msra.gmra.mrb[0].mxu0 %v333_v17 }
 0x11b   :  { %v304_v18 = vpop.f32.mrb[0].mxu0 }
 0x11c   :  { %v305_v19 = vpop.f32.mrb[1].mxu0 }
 0x11d   :  { %v306_v20 = vadd.f32 %v305_v19, %v304_v18  ;;  %v307_v21 = vpop.f32.mrb[2].mxu0 }
 0x11e   :  { %v308_v23 = vpop.f32.mrb[3].mxu0 }
 0x11f   :  { %v309_v24 = vadd.f32 %v308_v23, %v307_v21  ;;  %v226_v25 = vadd.f32 %v306_v20, %v260_v22 }
 0x121   :  { %v229_v26 = vadd.f32 %v309_v24, %v260_v22 }
 0x123   :  { %v286_v27 = vpack.c.bf16 %v229_v26, %v226_v25 }
 0x125   :  { %287 = vst [vmem:[#allocation7] sm:$0xff] %v286_v27  }
 0x126   :  { %391 = shalt.err (!%p388_p6)
}
 0x127   :  { %s392_s2 = scalar_lea.hbm %s483_s3, 128 }
 0x128   :  { %p393_p7 = scmp.ne.s32.totalorder %s483_s3, %s392_s2  ;;  %p396_p8 = scmp.lt.u32.totalorder %s392_s2, %s483_s3 }
 0x12a   :  { %p398_p9 = pnand %p396_p8, %p393_p7 }
 0x12c   :  { %401 = shalt.err (!%p398_p9)
}
 0x12d   :  { %253 = dma.vmem_to_hbm [thread:$0]  %s248_s14, 128, %s483_s3, [#allocation4], %s412_s0, %s412_s0, %s413_s9  }
 0x12e   :  { %406 = dma.done.wait [#allocation4], 128  }
 0x12f   :  { %407 = vsyncadd [#allocation4], 4294967168 }
 0x130   :  { %257 = vsyncpa [#allocation3], 1 }
 0x131   :  { %258 = vsyncpa [#allocation6], 1 }
 0x132   :  { %259 = vsyncpa [#allocation4], 1 }

</bundles_post_ra>
